<compile_context>
chip_gen: v7x
topology: tpu7x:2x2x1
jax: 0.10.0
libtpu: 0.0.40
codegen_flags: <defaults>
</compile_context>

<pallas_src>
import jax
import jax.numpy as jnp
from jax.experimental import pallas as pl
from jax.experimental.pallas import tpu as pltpu

MIB = 1024 * 1024


def _round_up(a, b):
    return (a + b - 1) // b * b


def _vmem_capacity_bytes():
    """Physical VMEM per TensorCore (128 MiB on v5e/v6e, 64 MiB on v7x)."""
    try:
        return int(pltpu.get_tpu_info().vmem_capacity_bytes)
    except Exception:
        pass
    try:
        kind = jax.devices()[0].device_kind.lower()
    except Exception:
        kind = ""
    return 64 * MIB if "7" in kind else 128 * MIB


def _auto_tiles(dmp, d_ff, cd_bytes, vmem_cap, budget):
    """Generation-aware (tm, tf) that keep the kernel MXU-bound yet fit VMEM."""
    if vmem_cap <= 64 * MIB:          # v7x-class part (64 MiB physical VMEM)
        tm, tf = 512, 512
    else:                             # v5e / v6e (128 MiB VMEM)
        tm, tf = 1024, 1024
    tf = min(tf, _round_up(d_ff, 128))

    def est(tm_, tf_):
        wts = 2 * 2 * dmp * tf_ * cd_bytes   # W1 + W2 chunks, double-buffered
        xin = 2 * tm_ * dmp * cd_bytes       # x row tile, double-buffered
        out = 2 * tm_ * dmp * 4              # output tile (worst case f32)
        acc = tm_ * dmp * 4                  # f32 accumulator (worst case)
        return wts + xin + out + acc + 4 * dmp * 4

    while est(tm, tf) > budget and tf > 256:
        tf -= 256
    while est(tm, tf) > budget and tm > 256:
        tm -= 256
    return tm, tf


def _ff_kernel_f32out(x_ref, w1_ref, b1_ref, w2_ref, b2_ref, o_ref):
    """f32 output: accumulate directly into the resident output block.

    x_ref (tm, dmp), w1_ref (dmp, tf), b1_ref (1, tf),
    w2_ref (tf, tn),  b2_ref (1, tn),  o_ref (tm, tn) f32.
    Grid axes: (row tile i, d_model column tile j, d_ff chunk k).
    """
    k = pl.program_id(2)
    h = jnp.dot(x_ref[...], w1_ref[...], preferred_element_type=jnp.float32)
    h = jnp.maximum(h + b1_ref[...], 0.0)                 # bias + ReLU per chunk
    part = jnp.dot(h.astype(w2_ref.dtype), w2_ref[...],
                   preferred_element_type=jnp.float32)

    @pl.when(k == 0)
    def _():
        o_ref[...] = part + b2_ref[...]

    @pl.when(k != 0)
    def _():
        o_ref[...] += part


def _ff_kernel_acc(x_ref, w1_ref, b1_ref, w2_ref, b2_ref, o_ref, acc_ref):
    """Narrow output dtype: accumulate in an f32 VMEM scratch, cast at the end."""
    k = pl.program_id(2)

    @pl.when(k == 0)
    def _():
        acc_ref[...] = jnp.zeros_like(acc_ref)

    h = jnp.dot(x_ref[...], w1_ref[...], preferred_element_type=jnp.float32)
    h = jnp.maximum(h + b1_ref[...], 0.0)
    acc_ref[...] += jnp.dot(h.astype(w2_ref.dtype), w2_ref[...],
                            preferred_element_type=jnp.float32)

    @pl.when(k == pl.num_programs(2) - 1)
    def _():
        o_ref[...] = (acc_ref[...] + b2_ref[...]).astype(o_ref.dtype)


class FeedForwardPallas:
    """Fused Linear->ReLU->Linear.  Weight prep (transpose/cast/pad) is done once."""

    def __init__(self, w1, b1, w2, b2, *, compute_dtype=None, tm=None, tf=None,
                 vmem_budget_bytes=None):
        d_ff, d_model = w1.shape
        assert w2.shape == (d_model, d_ff) and b1.shape == (d_ff,) and b2.shape == (d_model,)
        self.d_model, self.d_ff = d_model, d_ff
        # Default compute dtype follows the weights (exact for f32 users);
        # pass compute_dtype=jnp.bfloat16 for the fast MXU path (f32 accumulation).
        cd = jnp.dtype(w1.dtype if compute_dtype is None else compute_dtype)
        self.cd = cd

        cap = _vmem_capacity_bytes()
        if vmem_budget_bytes is None:
            budget = max(cap // 2, min(cap - 16 * MIB, int(cap * 0.85)))
        else:
            budget = int(vmem_budget_bytes)
        self.vmem_budget = int(budget)

        # Lane-dense, MXU-aligned padded d_model (256-aligned when it matters).
        dmp = _round_up(d_model, 128) if d_model <= 128 else _round_up(d_model, 256)
        auto_tm, auto_tf = _auto_tiles(dmp, d_ff, cd.itemsize, cap, budget)
        self.tm_max = int(tm) if tm is not None else auto_tm
        self.tf = int(tf) if tf is not None else auto_tf
        self.dmp = dmp
        self.dffp = _round_up(d_ff, self.tf)     # pad d_ff up to a tf multiple

        # Hoisted (once-per-module) weight transpose + cast + pad.
        self.w1_t = jnp.pad(jnp.asarray(w1).T.astype(cd),
                            ((0, dmp - d_model), (0, self.dffp - d_ff)))
        self.w2_t = jnp.pad(jnp.asarray(w2).T.astype(cd),
                            ((0, self.dffp - d_ff), (0, dmp - d_model)))
        self.b1 = jnp.pad(jnp.asarray(b1).astype(jnp.float32).reshape(1, d_ff),
                          ((0, 0), (0, self.dffp - d_ff)))
        self.b2 = jnp.pad(jnp.asarray(b2).astype(jnp.float32).reshape(1, d_model),
                          ((0, 0), (0, dmp - d_model)))

    def __call__(self, x):
        d_model, dmp, dffp, tf, cd = self.d_model, self.dmp, self.dffp, self.tf, self.cd
        assert x.shape[-1] == d_model
        orig_shape = x.shape
        out_dtype = x.dtype

        x2 = x.reshape(-1, d_model).astype(cd)
        m = x2.shape[0]

        # Row tile: clamp to the row count, round to dtype sublane packing.
        pack = max(8, 32 // cd.itemsize)               # 8 f32 / 16 bf16 / 32 int8
        tm = self.tm_max if m >= self.tm_max else _round_up(m, pack)
        m_pad = _round_up(m, tm)
        if m_pad != m or dmp != d_model:
            x2 = jnp.pad(x2, ((0, m_pad - m), (0, dmp - d_model)))

        m_tiles = m_pad // tm
        # Decode-like shapes: split d_model columns so both TCs get work.
        n_tiles = 2 if (m_tiles == 1 and dmp >= 512) else 1
        tn = dmp // n_tiles
        k_tiles = dffp // tf
        grid = (m_tiles, n_tiles, k_tiles)

        in_specs = [
            pl.BlockSpec((tm, dmp), lambda i, j, k: (i, 0)),   # x row tile
            pl.BlockSpec((dmp, tf), lambda i, j, k: (0, k)),   # W1^T chunk
            pl.BlockSpec((1, tf), lambda i, j, k: (0, k)),     # b1 chunk
            pl.BlockSpec((tf, tn), lambda i, j, k: (k, j)),    # W2^T chunk
            pl.BlockSpec((1, tn), lambda i, j, k: (0, j)),     # b2 column tile
        ]
        out_spec = pl.BlockSpec((tm, tn), lambda i, j, k: (i, j))

        if out_dtype == jnp.float32:
            kernel, scratch = _ff_kernel_f32out, []            # accumulate into o_ref
        else:
            kernel, scratch = _ff_kernel_acc, [pltpu.VMEM((tm, tn), jnp.float32)]

        out = pl.pallas_call(
            kernel,
            out_shape=jax.ShapeDtypeStruct((m_pad, dmp), out_dtype),
            grid_spec=pltpu.PrefetchScalarGridSpec(
                num_scalar_prefetch=0,
                grid=grid,
                in_specs=in_specs,
                out_specs=out_spec,
                scratch_shapes=scratch,
            ),
            compiler_params=pltpu.CompilerParams(
                dimension_semantics=("parallel", "parallel", "arbitrary"),
                vmem_limit_bytes=self.vmem_budget,
            ),
        )(x2, self.w1_t, self.b1, self.w2_t, self.b2)

        # Padded rows/columns are garbage-or-zero and are sliced off here.
        return out[:m, :d_model].reshape(orig_shape)


def init_params(key, d_model, d_ff, dtype=jnp.float32):
    """Deterministic init mimicking nn.Linear's uniform(-1/sqrt(fan_in), ...)."""
    k1, k2, k3, k4 = jax.random.split(key, 4)
    bound1 = 1.0 / jnp.sqrt(d_model)
    bound2 = 1.0 / jnp.sqrt(d_ff)
    w1 = jax.random.uniform(k1, (d_ff, d_model), dtype, -bound1, bound1)
    b1 = jax.random.uniform(k2, (d_ff,), dtype, -bound1, bound1)
    w2 = jax.random.uniform(k3, (d_model, d_ff), dtype, -bound2, bound2)
    b2 = jax.random.uniform(k4, (d_model,), dtype, -bound2, bound2)
    return w1, b1, w2, b2


def _ref_ff(x, w1, b1, w2, b2):
    return jnp.maximum(x @ w1.T + b1, 0.0) @ w2.T + b2


if __name__ == "__main__":
    key = jax.random.PRNGKey(0)
    k1, k2, k3, k4, k5, k6 = jax.random.split(key, 6)

    # --- Test 1: tiny transformer-ish shape (batch=2, seq=8, d_model=32, d_ff=64).
    batch, seq, d_model, d_ff = 2, 8, 32, 64
    x = jax.random.normal(k1, (batch, seq, d_model), jnp.float32)
    w1, b1, w2, b2 = init_params(k2, d_model, d_ff)
    ref = _ref_ff(x, w1, b1, w2, b2)

    ff_f32 = FeedForwardPallas(w1, b1, w2, b2)                     # f32 MXU path
    out = jax.block_until_ready(ff_f32(x))
    assert out.shape == x.shape
    assert jnp.allclose(out, ref, atol=1e-4, rtol=1e-4)

    ff_bf16 = FeedForwardPallas(w1, b1, w2, b2, compute_dtype=jnp.bfloat16)
    out = jax.block_until_ready(ff_bf16(x))                        # bf16 MXU, f32 out
    assert jnp.allclose(out, ref, atol=5e-2, rtol=5e-2)

    out = jax.block_until_ready(ff_bf16(x.astype(jnp.bfloat16)))   # bf16 out -> acc kernel
    assert out.dtype == jnp.bfloat16
    assert jnp.allclose(out.astype(jnp.float32), ref, atol=1.5e-1, rtol=1e-1)

    # --- Test 2: multiple row tiles and multiple d_ff chunks (accumulation path).
    d_model2, d_ff2 = 128, 384
    x2 = jax.random.normal(k3, (2, 96, d_model2), jnp.float32)      # m=192 rows
    p2 = init_params(k4, d_model2, d_ff2)
    ref2 = _ref_ff(x2, *p2)
    ff2 = FeedForwardPallas(*p2, tm=128, tf=128)                    # 2 row tiles, 3 k chunks
    out2 = jax.block_until_ready(ff2(x2))
    assert out2.shape == x2.shape
    assert jnp.allclose(out2, ref2, atol=1e-4, rtol=1e-4)

    # --- Test 3: single row tile -> d_model column split (dual-TC path on v7x).
    d_model3, d_ff3 = 320, 256
    x3 = jax.random.normal(k5, (2, 4, d_model3), jnp.float32)       # m=8 rows
    p3 = init_params(k6, d_model3, d_ff3)
    ref3 = _ref_ff(x3, *p3)
    ff3 = FeedForwardPallas(*p3)
    out3 = jax.block_until_ready(ff3(x3))
    assert out3.shape == x3.shape
    assert jnp.allclose(out3, ref3, atol=1e-4, rtol=1e-4)

    print("KERNEL_OK")
</pallas_src>

<mosaic_0001>
module attributes {stable_mosaic.version = 11 : i64} {
  func.func @_ff_kernel_f32out(%arg0: i32, %arg1: i32, %arg2: i32, %arg3: memref<16x128xf32, #tpu.memory_space<vmem>>, %arg4: memref<128x128xf32, #tpu.memory_space<vmem>>, %arg5: memref<1x128xf32, #tpu.memory_space<vmem>>, %arg6: memref<128x128xf32, #tpu.memory_space<vmem>>, %arg7: memref<1x128xf32, #tpu.memory_space<vmem>>, %arg8: memref<16x128xf32, #tpu.memory_space<vmem>>) attributes {dimension_semantics = [#tpu.dimension_semantics<parallel>, #tpu.dimension_semantics<parallel>, #tpu.dimension_semantics<arbitrary>], iteration_bounds = array<i64: 1, 1, 1>, scalar_prefetch = 0 : i64, scratch_operands = 0 : i64, tpu.core_type = #tpu.core_type<tc>, window_params = [{transform_indices = @transform_0, window_bounds = array<i64: 16, 128>}, {transform_indices = @transform_1, window_bounds = array<i64: 128, 128>}, {transform_indices = @transform_2, window_bounds = array<i64: 1, 128>}, {transform_indices = @transform_3, window_bounds = array<i64: 128, 128>}, {transform_indices = @transform_4, window_bounds = array<i64: 1, 128>}, {transform_indices = @transform_5, window_bounds = array<i64: 16, 128>}]} {
    %c0 = arith.constant 0 : index
    %c0_0 = arith.constant 0 : index
    %0 = vector.load %arg3[%c0, %c0_0] : memref<16x128xf32, #tpu.memory_space<vmem>>, vector<16x128xf32>
    %c0_1 = arith.constant 0 : index
    %c0_2 = arith.constant 0 : index
    %1 = vector.load %arg4[%c0_1, %c0_2] : memref<128x128xf32, #tpu.memory_space<vmem>>, vector<128x128xf32>
    %cst = arith.constant dense<0.000000e+00> : vector<16x128xf32>
    %2 = tpu.matmul %0, %1, %cst {dimension_numbers = #tpu.dot_dimension_numbers<[1], [0], [0], [1], [0, 0, 1, 1], [], []>} : vector<16x128xf32>, vector<128x128xf32>, vector<16x128xf32> -> vector<16x128xf32>
    %c0_3 = arith.constant 0 : index
    %c0_4 = arith.constant 0 : index
    %3 = vector.load %arg5[%c0_3, %c0_4] : memref<1x128xf32, #tpu.memory_space<vmem>>, vector<1x128xf32>
    %4 = vector.broadcast %3 : vector<1x128xf32> to vector<16x128xf32>
    %5 = arith.addf %2, %4 : vector<16x128xf32>
    %cst_5 = arith.constant 0.000000e+00 : f32
    %6 = vector.broadcast %cst_5 : f32 to vector<16x128xf32>
    %7 = arith.maximumf %5, %6 : vector<16x128xf32>
    %c0_6 = arith.constant 0 : index
    %c0_7 = arith.constant 0 : index
    %8 = vector.load %arg6[%c0_6, %c0_7] : memref<128x128xf32, #tpu.memory_space<vmem>>, vector<128x128xf32>
    %cst_8 = arith.constant dense<0.000000e+00> : vector<16x128xf32>
    %9 = tpu.matmul %7, %8, %cst_8 {dimension_numbers = #tpu.dot_dimension_numbers<[1], [0], [0], [1], [0, 0, 1, 1], [], []>} : vector<16x128xf32>, vector<128x128xf32>, vector<16x128xf32> -> vector<16x128xf32>
    %c0_i32 = arith.constant 0 : i32
    %10 = arith.cmpi eq, %arg2, %c0_i32 : i32
    %11 = arith.extui %10 : i1 to i32
    %c0_i32_9 = arith.constant 0 : i32
    %12 = arith.cmpi ne, %11, %c0_i32_9 : i32
    scf.if %12 {
      %c0_12 = arith.constant 0 : index
      %c0_13 = arith.constant 0 : index
      %16 = vector.load %arg7[%c0_12, %c0_13] : memref<1x128xf32, #tpu.memory_space<vmem>>, vector<1x128xf32>
      %17 = vector.broadcast %16 : vector<1x128xf32> to vector<16x128xf32>
      %18 = arith.addf %9, %17 : vector<16x128xf32>
      %c0_14 = arith.constant 0 : index
      %c0_15 = arith.constant 0 : index
      %19 = vector.load %arg8[%c0_14, %c0_15] : memref<16x128xf32, #tpu.memory_space<vmem>>, vector<16x128xf32>
      tpu.vector_store %arg8[%c0_14, %c0_15], %18 {strides = array<i32>} : memref<16x128xf32, #tpu.memory_space<vmem>>, vector<16x128xf32>,
    } else {
    }
    %c0_i32_10 = arith.constant 0 : i32
    %13 = arith.cmpi ne, %arg2, %c0_i32_10 : i32
    %14 = arith.extui %13 : i1 to i32
    %c0_i32_11 = arith.constant 0 : i32
    %15 = arith.cmpi ne, %14, %c0_i32_11 : i32
    scf.if %15 {
      %c0_12 = arith.constant 0 : index
      %c0_13 = arith.constant 0 : index
      %16 = vector.load %arg8[%c0_12, %c0_13] : memref<16x128xf32, #tpu.memory_space<vmem>>, vector<16x128xf32>
      %17 = arith.addf %16, %9 : vector<16x128xf32>
      %c0_14 = arith.constant 0 : index
      %c0_15 = arith.constant 0 : index
      %18 = vector.load %arg8[%c0_14, %c0_15] : memref<16x128xf32, #tpu.memory_space<vmem>>, vector<16x128xf32>
      tpu.vector_store %arg8[%c0_14, %c0_15], %17 {strides = array<i32>} : memref<16x128xf32, #tpu.memory_space<vmem>>, vector<16x128xf32>,
    } else {
    }
    return
  }
  func.func @transform_0(%arg0: i32, %arg1: i32, %arg2: i32) -> (i32, i32) {
    %c0_i32 = arith.constant 0 : i32
    %c0_i32_0 = arith.constant 0 : i32
    return %arg0, %c0_i32 : i32, i32
  }
  func.func @transform_1(%arg0: i32, %arg1: i32, %arg2: i32) -> (i32, i32) {
    %c0_i32 = arith.constant 0 : i32
    %c0_i32_0 = arith.constant 0 : i32
    return %c0_i32, %arg2 : i32, i32
  }
  func.func @transform_2(%arg0: i32, %arg1: i32, %arg2: i32) -> (i32, i32) {
    %c0_i32 = arith.constant 0 : i32
    %c0_i32_0 = arith.constant 0 : i32
    return %c0_i32, %arg2 : i32, i32
  }
  func.func @transform_3(%arg0: i32, %arg1: i32, %arg2: i32) -> (i32, i32) {
    %c0_i32 = arith.constant 0 : i32
    return %arg2, %arg1 : i32, i32
  }
  func.func @transform_4(%arg0: i32, %arg1: i32, %arg2: i32) -> (i32, i32) {
    %c0_i32 = arith.constant 0 : i32
    %c0_i32_0 = arith.constant 0 : i32
    return %c0_i32, %arg1 : i32, i32
  }
  func.func @transform_5(%arg0: i32, %arg1: i32, %arg2: i32) -> (i32, i32) {
    %c0_i32 = arith.constant 0 : i32
    return %arg0, %arg1 : i32, i32
  }
}

</mosaic_0001>

<bundles_post_ra>
// kernel: tpu_custom_call.1
= control target key start
LH: loop header
LB: loop body
LE: loop exit
PB: predicated region body
PF: predicated region fallthrough
CT: control target
= control target key end

     0   :  { %10 = vsyncpa [#allocation3], 0  ;;  %s771_s0 = inlined_call_operand.hbm [shape: f32[16,128], index: 0, kind: input, shape index: {}]   ;;  %s772_s1 = inlined_call_operand.hbm [shape: f32[128,128], index: 1, kind: input, shape index: {}]   ;;  %s773_s2 = inlined_call_operand.hbm [shape: f32[1,128], index: 2, kind: input, shape index: {}]   ;;  %s774_s3 = inlined_call_operand.hbm [shape: f32[128,128], index: 3, kind: input, shape index: {}]   ;;  %s775_s4 = inlined_call_operand.hbm [shape: f32[1,128], index: 4, kind: input, shape index: {}]   ;;  %s776_s5 = inlined_call_operand.hbm [shape: f32[16,128], index: 5, kind: output, shape index: {}]  }
   0x1   :  { %11 = vsyncpa [#allocation6], 0 }
   0x2   :  { %12 = vsyncpa [#allocation9], 0 }
   0x3   :  { %13 = vsyncpa [#allocation4], 0  ;;  %s642_s18 = smov [#allocation5]   ;;  %s643_s20 = smov [#allocation8]  }
   0x4   :  { %s31_s19 = sshll.u32 %s642_s18, 4  ;;  %s53_s21 = sshll.u32 %s643_s20, 4  ;;  %s32_s19 = int_to_ptr.vmem [resolvable:$true] %s31_s19  ;;  %s680_s21 = int_to_ptr.vmem [resolvable:$true] %s53_s21 }
   0x5   :  { %s502_s24 = scalar_lea.hbm %s772_s1, 2048 }
   0x6   :  { %p503_p0 = scmp.ne.s32.totalorder %s772_s1, %s502_s24  ;;  %p506_p1 = scmp.lt.u32.totalorder %s502_s24, %s772_s1 }
   0x8   :  { %p508_p2 = pnand %p506_p1, %p503_p0 }
   0xa   :  { %511 = shalt.err (!%p508_p2)
}
   0xb   :  { %s512_s29 = scalar_lea.vmem %s32_s19, 2048  ;;  %p517_p4 = scmp.lt.s32.totalorder %s32_s19, %s32_s19 }
   0xc   :  { %p513_p3 = scmp.ne.s32.totalorder %s32_s19, %s512_s29  ;;  %p518_p5 = scmp.lt.s32.totalorder %s512_s29, %s512_s29 }
   0xe   :  { %p519_p6 = por %p518_p5, %p517_p4 }
  0x10   :  { %p520_p7 = pnand %p519_p6, %p513_p3 }
  0x12   :  { %523 = shalt.err (!%p520_p7)
}
  0x13   :  { %s644_s30 = smov 128   ;;  %s645_s6 = smov 8  }
  0x14   :  { %37 = dma.hbm_to_vmem [thread:$0]  %s772_s1, 2048, %s32_s19, [#allocation6], %s644_s30, %s644_s30, %s645_s6  }
  0x15   :  { %s524_s11 = scalar_lea.hbm %s774_s3, 2048 }
  0x16   :  { %p525_p8 = scmp.ne.s32.totalorder %s774_s3, %s524_s11  ;;  %p528_p9 = scmp.lt.u32.totalorder %s524_s11, %s774_s3 }
  0x18   :  { %p530_p10 = pnand %p528_p9, %p525_p8 }
  0x1a   :  { %533 = shalt.err (!%p530_p10)
}
  0x1b   :  { %s534_s16 = scalar_lea.vmem %s680_s21, 2048  ;;  %p539_p12 = scmp.lt.s32.totalorder %s680_s21, %s680_s21 }
  0x1c   :  { %p535_p11 = scmp.ne.s32.totalorder %s680_s21, %s534_s16  ;;  %p540_p13 = scmp.lt.s32.totalorder %s534_s16, %s534_s16 }
  0x1e   :  { %p541_p0 = por %p540_p13, %p539_p12 }
  0x20   :  { %p542_p1 = pnand %p541_p0, %p535_p11 }
  0x22   :  { %545 = shalt.err (!%p542_p1)
}
  0x23   :  { %59 = dma.hbm_to_vmem [thread:$0]  %s774_s3, 2048, %s680_s21, [#allocation9], %s644_s30, %s644_s30, %s645_s6  }
  0x24   :  { %s646_s18 = smov [#allocation2]   ;;  %s647_s20 = smov [#allocation7]  }
  0x25   :  { %s19_s19 = sshll.u32 %s646_s18, 4  ;;  %s44_s22 = sshll.u32 %s647_s20, 4  ;;  %s20_s19 = int_to_ptr.vmem [resolvable:$true] %s19_s19  ;;  %s45_s22 = int_to_ptr.vmem [resolvable:$true] %s44_s22 }
  0x26   :  { %s546_s25 = scalar_lea.hbm %s771_s0, 256 }
  0x27   :  { %p547_p2 = scmp.ne.s32.totalorder %s771_s0, %s546_s25  ;;  %p550_p3 = scmp.lt.u32.totalorder %s546_s25, %s771_s0 }
  0x29   :  { %p552_p4 = pnand %p550_p3, %p547_p2 }
  0x2b   :  { %555 = shalt.err (!%p552_p4)
}
  0x2c   :  { %s556_s3 = scalar_lea.vmem %s20_s19, 256  ;;  %p561_p6 = scmp.lt.s32.totalorder %s20_s19, %s20_s19 }
  0x2d   :  { %p557_p5 = scmp.ne.s32.totalorder %s20_s19, %s556_s3  ;;  %p562_p7 = scmp.lt.s32.totalorder %s556_s3, %s556_s3 }
  0x2f   :  { %p563_p8 = por %p562_p7, %p561_p6 }
  0x31   :  { %p564_p9 = pnand %p563_p8, %p557_p5 }
  0x33   :  { %567 = shalt.err (!%p564_p9)
}
  0x34   :  { %25 = dma.hbm_to_vmem [thread:$0]  %s771_s0, 256, %s20_s19, [#allocation3], %s644_s30, %s644_s30, %s645_s6  }
  0x35   :  { %s568_s10 = scalar_lea.hbm %s773_s2, 16 }
  0x36   :  { %p569_p10 = scmp.ne.s32.totalorder %s773_s2, %s568_s10  ;;  %p572_p11 = scmp.lt.u32.totalorder %s568_s10, %s773_s2 }
  0x38   :  { %p574_p12 = pnand %p572_p11, %p569_p10 }
  0x3a   :  { %577 = shalt.err (!%p574_p12)
}
  0x3b   :  { %s578_s15 = scalar_lea.vmem %s45_s22, 16  ;;  %s582_s16 = scalar_lea.vmem %s45_s22, 32 }
  0x3c   :  { %p579_p13 = scmp.ne.s32.totalorder %s45_s22, %s578_s15  ;;  %p583_p0 = scmp.lt.s32.totalorder %s45_s22, %s45_s22 }
  0x3d   :  { %p584_p1 = scmp.lt.s32.totalorder %s582_s16, %s578_s15 }
  0x3f   :  { %p585_p2 = por %p584_p1, %p583_p0 }
  0x41   :  { %p586_p3 = pnand %p585_p2, %p579_p13 }
  0x43   :  { %589 = shalt.err (!%p586_p3)
}
  0x44   :  { %47 = dma.hbm_to_vmem [thread:$0]  %s773_s2, 16, %s45_s22, [#allocation6]  }
  0x45   :  { %s648_s17 = smov [#allocation10]   ;;  %s590_s23 = scalar_lea.hbm %s775_s4, 16 }
  0x46   :  { %s66_s18 = sshll.u32 %s648_s17, 4  ;;  %p591_p4 = scmp.ne.s32.totalorder %s775_s4, %s590_s23  ;;  %s67_s18 = int_to_ptr.vmem [resolvable:$true] %s66_s18 }
  0x47   :  { %p594_p5 = scmp.lt.u32.totalorder %s590_s23, %s775_s4 }
  0x49   :  { %p596_p6 = pnand %p594_p5, %p591_p4 }
  0x4b   :  { %599 = shalt.err (!%p596_p6)
}
  0x4c   :  { %s600_s28 = scalar_lea.vmem %s67_s18, 16  ;;  %s604_s2 = scalar_lea.vmem %s67_s18, 32 }
  0x4d   :  { %p601_p7 = scmp.ne.s32.totalorder %s67_s18, %s600_s28  ;;  %p605_p8 = scmp.lt.s32.totalorder %s67_s18, %s67_s18 }
  0x4e   :  { %p606_p9 = scmp.lt.s32.totalorder %s604_s2, %s600_s28 }
  0x50   :  { %p607_p10 = por %p606_p9, %p605_p8 }
  0x52   :  { %p608_p11 = pnand %p607_p10, %p601_p7 }
  0x54   :  { %611 = shalt.err (!%p608_p11)
}
  0x55   :  { %69 = dma.hbm_to_vmem [thread:$0]  %s775_s4, 16, %s67_s18, [#allocation9]  }
  0x56   :  { %634 = dma.done.wait [#allocation3], 256  }
  0x57   :  { %635 = vsyncadd [#allocation3], 4294967040 }
  0x58   :  { %636 = dma.done.wait [#allocation6], 2064  }
  0x59   :  { %637 = vsyncadd [#allocation6], 4294965232 }
  0x5a   :  { %638 = dma.done.wait [#allocation9], 2064  }
  0x5b   :  { %639 = vsyncadd [#allocation9], 4294965232  ;;  %v87_v0 = vld [vmem:[#allocation5] sm:$0xff]  ;;  %v88_v1 = vld [vmem:[#allocation5 + $0x8] sm:$0xff]  ;;  %s649_s4 = smov [#allocation11]  }
  0x5c   :  { %v89_v2 = vld [vmem:[#allocation5 + $0x10] sm:$0xff]  ;;  %v430_v3 = vpack.c.bf16 %v88_v1, %v87_v0  ;;  %v90_v4 = vld [vmem:[#allocation5 + $0x18] sm:$0xff]  ;;  %v91_v6 = vld [vmem:[#allocation5 + $0x20] sm:$0xff]  ;;  %s308_s3 = sshll.u32 %s649_s4, 4  ;;  %s309_s3 = int_to_ptr.vmem [resolvable:$true] %s308_s3 }
  0x5d   :  { %v434_v5 = vpack.c.bf16 %v90_v4, %v89_v2  ;;  %v92_v7 = vld [vmem:[#allocation5 + $0x28] sm:$0xff]  ;;  %v93_v9 = vld [vmem:[#allocation5 + $0x30] sm:$0xff]  ;;  %v94_v10 = vld [vmem:[#allocation5 + $0x38] sm:$0xff]  ;;  %s612_s21 = scalar_lea.vmem %s309_s3, 256  ;;  %p617_p13 = scmp.lt.s32.totalorder %s309_s3, %s309_s3 }
  0x5e   :  { %431 = vmatprep.subr.bf16.mxu0 %v430_v3  ;;  %v438_v8 = vpack.c.bf16 %v92_v7, %v91_v6  ;;  %v85_v11 = vld [vmem:[#allocation2] sm:$0xff]  ;;  %v187_v12 = vld [vmem:[#allocation8] sm:$0xff]  ;;  %v190_v16 = vld [vmem:[#allocation8 + $0x18] sm:$0xff]  ;;  %v442_v20 = vpack.c.bf16 %v94_v10, %v93_v9  ;;  %p613_p12 = scmp.ne.s32.totalorder %s309_s3, %s612_s21  ;;  %p618_p0 = scmp.lt.s32.totalorder %s612_s21, %s612_s21 }
  0x5f   :  { %433 = vmatpush3.bf16.msra.mxu0 %v430_v3  ;;  %392 = vmatprep.mubr.f32.mxu0 %v85_v11  ;;  %v188_v13 = vld [vmem:[#allocation8 + $0x8] sm:$0xff]  ;;  %v189_v14 = vld [vmem:[#allocation8 + $0x10] sm:$0xff]  ;;  %v191_v18 = vld [vmem:[#allocation8 + $0x20] sm:$0xff] }
  0x60   :  { %435 = vmatprep.subr.bf16.mxu0 %v434_v5  ;;  %v462_v15 = vpack.c.bf16 %v188_v13, %v187_v12  ;;  %v466_v17 = vpack.c.bf16 %v190_v16, %v189_v14  ;;  %v192_v19 = vld [vmem:[#allocation8 + $0x28] sm:$0xff]  ;;  %v95_v21 = vld [vmem:[#allocation5 + $0x40] sm:$0xff]  ;;  %v193_v24 = vld [vmem:[#allocation8 + $0x30] sm:$0xff]  ;;  %p619_p1 = por %p618_p0, %p617_p13 }
  0x61   :  { %v96_v22 = vld [vmem:[#allocation5 + $0x48] sm:$0xff]  ;;  %v470_v23 = vpack.c.bf16 %v192_v19, %v191_v18  ;;  %v194_v25 = vld [vmem:[#allocation8 + $0x38] sm:$0xff]  ;;  %v97_v27 = vld [vmem:[#allocation5 + $0x50] sm:$0xff] }
  0x62   :  { %463 = vmatprep.subr.bf16.mxu1 %v462_v15  ;;  %v446_v26 = vpack.c.bf16 %v96_v22, %v95_v21  ;;  %v98_v28 = vld [vmem:[#allocation5 + $0x58] sm:$0xff]  ;;  %v474_v29 = vpack.c.bf16 %v194_v25, %v193_v24  ;;  %v195_v30 = vld [vmem:[#allocation8 + $0x40] sm:$0xff]  ;;  %v196_v31 = vld [vmem:[#allocation8 + $0x48] sm:$0xff]  ;;  %p620_p2 = pnand %p619_p1, %p613_p12 }
  0x63   :  { %437 = vmatpush3.bf16.msra.mxu0 %v434_v5  ;;  %465 = vmatpush3.bf16.msra.mxu1 %v462_v15  ;;  %v450_v32 = vpack.c.bf16 %v98_v28, %v97_v27  ;;  %v99_v33 = vld [vmem:[#allocation5 + $0x60] sm:$0xff]  ;;  %v100_v34 = vld [vmem:[#allocation5 + $0x68] sm:$0xff]  ;;  %v478_v35 = vpack.c.bf16 %v196_v31, %v195_v30  ;;  %v197_v36 = vld [vmem:[#allocation8 + $0x50] sm:$0xff] }
  0x64   :  { %439 = vmatprep.subr.bf16.mxu0 %v438_v8  ;;  %467 = vmatprep.subr.bf16.mxu1 %v466_v17  ;;  %v198_v37 = vld [vmem:[#allocation8 + $0x58] sm:$0xff]  ;;  %v454_v38 = vpack.c.bf16 %v100_v34, %v99_v33  ;;  %v101_v39 = vld [vmem:[#allocation5 + $0x70] sm:$0xff]  ;;  %v199_v42 = vld [vmem:[#allocation8 + $0x60] sm:$0xff] }
  0x65   :  { %v102_v40 = vld [vmem:[#allocation5 + $0x78] sm:$0xff]  ;;  %v482_v41 = vpack.c.bf16 %v198_v37, %v197_v36  ;;  %v200_v43 = vld [vmem:[#allocation8 + $0x68] sm:$0xff]  ;;  %v322_v50 = vld [vmem:[#allocation7] ss:$0 sm:$0xff] }
  0x66   :  { %v458_v44 = vpack.c.bf16 %v102_v40, %v101_v39  ;;  %v486_v45 = vpack.c.bf16 %v200_v43, %v199_v42  ;;  %v86_v46 = vld [vmem:[#allocation2 + $0x8] sm:$0xff]  ;;  %v323_v57 = vld [vmem:[#allocation10] ss:$0 sm:$0xff] }
  0x67   :  { %441 = vmatpush3.bf16.msra.mxu0 %v438_v8  ;;  %469 = vmatpush3.bf16.msra.mxu1 %v466_v17  ;;  %v201_v47 = vld [vmem:[#allocation8 + $0x70] sm:$0xff]  ;;  %v202_v48 = vld [vmem:[#allocation8 + $0x78] sm:$0xff] }
  0x68   :  { %443 = vmatprep.subr.bf16.mxu0 %v442_v20  ;;  %471 = vmatprep.subr.bf16.mxu1 %v470_v23  ;;  %v490_v49 = vpack.c.bf16 %v202_v48, %v201_v47 }
  0x6b   :  { %445 = vmatpush3.bf16.msra.mxu0 %v442_v20  ;;  %473 = vmatpush3.bf16.msra.mxu1 %v470_v23 }
  0x6c   :  { %447 = vmatprep.subr.bf16.mxu0 %v446_v26  ;;  %475 = vmatprep.subr.bf16.mxu1 %v474_v29 }
  0x6f   :  { %449 = vmatpush3.bf16.msra.mxu0 %v446_v26  ;;  %477 = vmatpush3.bf16.msra.mxu1 %v474_v29 }
  0x70   :  { %451 = vmatprep.subr.bf16.mxu0 %v450_v32  ;;  %479 = vmatprep.subr.bf16.mxu1 %v478_v35 }
  0x73   :  { %453 = vmatpush3.bf16.msra.mxu0 %v450_v32  ;;  %481 = vmatpush3.bf16.msra.mxu1 %v478_v35 }
  0x74   :  { %455 = vmatprep.subr.bf16.mxu0 %v454_v38  ;;  %483 = vmatprep.subr.bf16.mxu1 %v482_v41 }
  0x77   :  { %457 = vmatpush3.bf16.msra.mxu0 %v454_v38  ;;  %485 = vmatpush3.bf16.msra.mxu1 %v482_v41 }
  0x78   :  { %459 = vmatprep.subr.bf16.mxu0 %v458_v44  ;;  %487 = vmatprep.subr.bf16.mxu1 %v486_v45 }
  0x7b   :  { %461 = vmatpush3.bf16.msra.mxu0 %v458_v44  ;;  %489 = vmatpush3.bf16.msra.mxu1 %v486_v45 }
  0x7c   :  { %491 = vmatprep.subr.bf16.mxu1 %v490_v49 }
  0x7e   :  { %393 = vmatmul.mubr.f32.vlgmr.msra.gmra.mrb[0].mxu0 %v86_v46 }
  0x7f   :  { %493 = vmatpush3.bf16.msra.mxu1 %v490_v49 }
 0x151   :  { %v394_v51 = vpop.f32.mrb[0].mxu0 }
 0x152   :  { %v182_v52 = vadd.f32 %v394_v51, %v322_v50  ;;  %v176_v53 = vpop.f32.mrb[1].mxu0 }
 0x153   :  { %v177_v54 = vadd.f32 %v322_v50, %v176_v53 }
 0x154   :  { %v186_v56 = vmax.f32 %v182_v52, 0.0 }
 0x155   :  { %v185_v55 = vmax.f32 %v177_v54, 0.0 }
 0x157   :  { %427 = vmatprep.mubr.f32.mxu1 %v185_v55 }
 0x158   :  { %428 = vmatmul.mubr.f32.vlgmr.msra.gmra.mrb[0].mxu1 %v186_v56 }
 0x22b   :  { %v429_v58 = vpop.f32.mrb[0].mxu1 }
 0x22c   :  { %v290_v59 = vadd.f32 %v429_v58, %v323_v57  ;;  %v269_v60 = vpop.f32.mrb[1].mxu1 }
 0x22d   :  { %v289_v61 = vadd.f32 %v323_v57, %v269_v60 }
 0x22e   :  { %292 = vst [vmem:[#allocation11 + $0x8] sm:$0xff] %v290_v59 }
 0x22f   :  { %291 = vst [vmem:[#allocation11] sm:$0xff] %v289_v61 }
 0x230   :  { %623 = shalt.err (!%p620_p2)
}
 0x231   :  { %s624_s9 = scalar_lea.hbm %s776_s5, 256 }
 0x232   :  { %p625_p3 = scmp.ne.s32.totalorder %s776_s5, %s624_s9  ;;  %p628_p4 = scmp.lt.u32.totalorder %s624_s9, %s776_s5 }
 0x234   :  { %p630_p5 = pnand %p628_p4, %p625_p3 }
 0x236   :  { %633 = shalt.err (!%p630_p5)
}
 0x237   :  { %314 = dma.vmem_to_hbm [thread:$0]  %s309_s3, 256, %s776_s5, [#allocation4], %s644_s30, %s644_s30, %s645_s6  }
 0x238   :  { %640 = dma.done.wait [#allocation4], 256  }
 0x239   :  { %641 = vsyncadd [#allocation4], 4294967040 }
 0x23a   :  { %318 = vsyncpa [#allocation3], 1 }
 0x23b   :  { %319 = vsyncpa [#allocation6], 1 }
 0x23c   :  { %320 = vsyncpa [#allocation9], 1 }
 0x23d   :  { %321 = vsyncpa [#allocation4], 1 }

</bundles_post_ra>
